<compile_context>
chip_gen: v7x
topology: tpu7x:2x2x1
jax: 0.10.0
libtpu: 0.0.40
codegen_flags: <defaults>
</compile_context>

<pallas_src>
import functools
import math

import jax
import jax.numpy as jnp
from jax.experimental import pallas as pl
from jax.experimental.pallas import tpu as pltpu


# ----------------------------------------------------------------------------
# constants / helpers
# ----------------------------------------------------------------------------
_LANES = 128
_ROW_ALIGN = 32                      # covers f32 (8), bf16 (16), int8 (32) sublane tiling
_BLOCK_BYTES_TARGET = 6 * 1024 * 1024   # combined input-block bytes per grid step (x2 when double-buffered)
_VMEM_LIMIT_BYTES = 48 * 1024 * 1024    # explicit scoped-VMEM limit (<=48 MiB is safe on v7x's 64 MiB)


def _round_up(x, m):
    return (x + m - 1) // m * m


def _num_splits():
    """2-way parallel leading axis on chips with 2 TensorCores per device, else 1."""
    try:
        kind = jax.devices()[0].device_kind.lower()
    except Exception:
        return 1
    if "v7" in kind or "7x" in kind or "v4" in kind:
        return 2
    return 1


def _pick_block_rows(n_rows_per_split, resident_row_bytes, forced=None):
    """Largest 32-aligned row count whose input block stays near _BLOCK_BYTES_TARGET."""
    if forced is not None:
        return int(max(_ROW_ALIGN, _round_up(int(forced), _ROW_ALIGN)))
    cap = max(_ROW_ALIGN,
              (_BLOCK_BYTES_TARGET // max(resident_row_bytes, 1)) // _ROW_ALIGN * _ROW_ALIGN)
    return int(min(cap, _round_up(max(n_rows_per_split, 1), _ROW_ALIGN)))


def _logit_threshold(t):
    """sigmoid(x) > t  <=>  x > logit(t)  (sigmoid strictly monotone)."""
    t = float(t)
    if t <= 0.0:
        return float("-inf")
    if t >= 1.0:
        return float("inf")
    return math.log(t / (1.0 - t))


# ----------------------------------------------------------------------------
# kernels
# ----------------------------------------------------------------------------
def _acc_multiclass_kernel(x_ref, t_ref, out_ref, acc_ref, *, inv_n):
    # x_ref: (BLOCK_N, C) logits (native dtype); t_ref: (BLOCK_N, 1) int32 labels (-1 for padding)
    # out_ref: (1, 1) f32 partial accuracy for this split
    # acc_ref: (BLOCK_N, 1) int32 vector accumulator (elementwise add per step, reduce once at end)
    i = pl.program_id(1)

    @pl.when(i == 0)
    def _():
        acc_ref[...] = jnp.zeros_like(acc_ref)

    x = x_ref[...]                                              # no pre-kernel upcast
    bn, c = x.shape
    # argmax over the class axis, first-occurrence tie-break (matches torch.max)
    max_val = jnp.max(x, axis=1, keepdims=True)                 # (BN, 1)
    lane_ids = jax.lax.broadcasted_iota(jnp.int32, (bn, c), 1)  # (BN, C)
    idx = jnp.min(jnp.where(x == max_val, lane_ids, jnp.int32(c)),
                  axis=1, keepdims=True)                        # (BN, 1) int32
    acc_ref[...] += (idx == t_ref[...]).astype(jnp.int32)       # padded rows (label -1) never match

    @pl.when(i == pl.num_programs(1) - 1)
    def _():
        total = jnp.sum(acc_ref[...], keepdims=True)            # single reduce at the very end
        out_ref[...] = total.astype(jnp.float32) * jnp.float32(inv_n)


def _acc_binary_kernel(thr_ref, x_ref, t_ref, out_ref, acc_ref, *, inv_n):
    # thr_ref: (1,) f32 SMEM scalar (precomputed logit threshold)
    # x_ref: (BLOCK_R, 128) logits (native dtype); t_ref: (BLOCK_R, 128) int8 targets (0/1, sentinel 2)
    # acc_ref: (8, 128) int32 vector accumulator -> per step only VPU adds, no XLU reduce
    i = pl.program_id(1)

    @pl.when(i == 0)
    def _():
        acc_ref[...] = jnp.zeros_like(acc_ref)

    x = x_ref[...].astype(jnp.float32)                  # cast after the narrow DMA
    thr = thr_ref[0]
    pred = (x > thr).astype(jnp.int8)                   # == (sigmoid(x) > threshold), no EUP op
    correct = (pred == t_ref[...]).astype(jnp.int32)    # (BLOCK_R, 128); sentinel 2 never matches
    br = correct.shape[0]
    # group-of-8 sublane fold: reshape is data-movement free, reduction is pure vreg adds
    acc_ref[...] += jnp.sum(correct.reshape(br // 8, 8, _LANES), axis=0)

    @pl.when(i == pl.num_programs(1) - 1)
    def _():
        total = jnp.sum(acc_ref[...], keepdims=True)    # single cross-lane/sublane reduce
        out_ref[...] = total.astype(jnp.float32) * jnp.float32(inv_n)


# ----------------------------------------------------------------------------
# wrappers
# ----------------------------------------------------------------------------
def _multiclass_accuracy(output, target, force_splits, block_rows):
    n, c = output.shape
    tgt = jnp.asarray(target, jnp.int32).reshape(n, 1)

    itemsize = jnp.dtype(output.dtype).itemsize
    # VMEM-resident bytes per block row: lane-padded logits tile + lane-padded int32 label tile
    row_bytes = _round_up(c, _LANES) * itemsize + _LANES * 4

    splits = force_splits if force_splits is not None else _num_splits()
    if n < 2 * _ROW_ALIGN and force_splits is None:
        splits = 1
    per_split = -(-n // splits)
    block_n = _pick_block_rows(per_split, row_bytes, block_rows)

    n_pad = _round_up(n, block_n * splits)
    if n_pad != n:
        output = jnp.pad(output, ((0, n_pad - n), (0, 0)))
        tgt = jnp.pad(tgt, ((0, n_pad - n), (0, 0)), constant_values=-1)  # never matches
    steps = n_pad // (block_n * splits)

    kernel = functools.partial(_acc_multiclass_kernel, inv_n=1.0 / n)
    out = pl.pallas_call(
        kernel,
        out_shape=jax.ShapeDtypeStruct((splits, 1), jnp.float32),
        grid=(splits, steps),
        in_specs=[
            pl.BlockSpec((block_n, c), lambda p, i, s=steps: (p * s + i, 0)),
            pl.BlockSpec((block_n, 1), lambda p, i, s=steps: (p * s + i, 0)),
        ],
        out_specs=pl.BlockSpec((1, 1), lambda p, i: (p, 0)),
        scratch_shapes=[pltpu.VMEM((block_n, 1), jnp.int32)],
        compiler_params=pltpu.CompilerParams(
            dimension_semantics=("parallel", "arbitrary"),
            vmem_limit_bytes=_VMEM_LIMIT_BYTES),
    )(output, tgt)
    return jnp.sum(out)


def _binary_accuracy(output, target, threshold, force_splits, block_rows):
    flat = output.reshape(-1)
    m = flat.shape[0]
    t = jnp.asarray(target).reshape(-1)
    # int8 targets: exact 0 -> 0, exact 1 -> 1, anything else -> sentinel 2 (never equals a 0/1 pred,
    # which is exactly the reference behavior for non-{0,1} targets).
    t8 = jnp.where(t == 1, jnp.int8(1), jnp.where(t == 0, jnp.int8(0), jnp.int8(2)))

    itemsize = jnp.dtype(flat.dtype).itemsize
    rows = -(-m // _LANES)
    row_bytes = _LANES * itemsize + _LANES * 1   # logits + int8 targets per 128-lane row

    splits = force_splits if force_splits is not None else _num_splits()
    if rows < 2 * _ROW_ALIGN and force_splits is None:
        splits = 1
    per_split = -(-rows // splits)
    block_r = _pick_block_rows(per_split, row_bytes, block_rows)

    rows_pad = _round_up(rows, block_r * splits)
    pad = rows_pad * _LANES - m
    if pad:
        flat = jnp.pad(flat, (0, pad))
        t8 = jnp.pad(t8, (0, pad), constant_values=2)
    x2 = flat.reshape(rows_pad, _LANES)
    t2 = t8.reshape(rows_pad, _LANES)

    thr = jnp.asarray([_logit_threshold(threshold)], jnp.float32)
    steps = rows_pad // (block_r * splits)

    kernel = functools.partial(_acc_binary_kernel, inv_n=1.0 / m)
    out = pl.pallas_call(
        kernel,
        out_shape=jax.ShapeDtypeStruct((splits, 1), jnp.float32),
        grid=(splits, steps),
        in_specs=[
            pl.BlockSpec(memory_space=pltpu.MemorySpace.SMEM),   # threshold scalar
            pl.BlockSpec((block_r, _LANES), lambda p, i, s=steps: (p * s + i, 0)),
            pl.BlockSpec((block_r, _LANES), lambda p, i, s=steps: (p * s + i, 0)),
        ],
        out_specs=pl.BlockSpec((1, 1), lambda p, i: (p, 0)),
        scratch_shapes=[pltpu.VMEM((8, _LANES), jnp.int32)],
        compiler_params=pltpu.CompilerParams(
            dimension_semantics=("parallel", "arbitrary"),
            vmem_limit_bytes=_VMEM_LIMIT_BYTES),
    )(thr, x2, t2)
    return jnp.sum(out)


def accuracy(output, target, threshold=0.5, *, _force_splits=None, _block_rows=None):
    """Pallas equivalent of Accuracy(threshold).forward(output, target) -> scalar f32."""
    output = jnp.asarray(output)  # keep native dtype; no pre-kernel upcast
    if output.ndim == 2 and output.shape[-1] > 1:
        return _multiclass_accuracy(output, target, _force_splits, _block_rows)
    return _binary_accuracy(output, target, threshold, _force_splits, _block_rows)


# ----------------------------------------------------------------------------
# pure-JAX reference (mirrors the PyTorch module)
# ----------------------------------------------------------------------------
def _accuracy_ref(output, target, threshold=0.5):
    output = jnp.asarray(output, jnp.float32)
    if output.ndim == 2 and output.shape[-1] > 1:
        indices = jnp.argmax(jax.nn.softmax(output, axis=1), axis=1)
        return jnp.mean((indices == jnp.asarray(target)).astype(jnp.float32))
    prob = jax.nn.sigmoid(output)
    indices = (prob > threshold).astype(jnp.float32)
    return jnp.mean((indices == jnp.asarray(target, jnp.float32)).astype(jnp.float32))


if __name__ == "__main__":
    key = jax.random.PRNGKey(0)
    ks = jax.random.split(key, 10)

    # ---- multiclass: logits (N=16, C=32), integer labels ----
    N, C = 16, 32
    logits = jax.random.normal(ks[0], (N, C), dtype=jnp.float32)
    labels = jax.random.randint(ks[1], (N,), 0, C, dtype=jnp.int32)
    acc_mc = accuracy(logits, labels)
    jax.block_until_ready(acc_mc)
    assert jnp.allclose(acc_mc, _accuracy_ref(logits, labels), atol=1e-6), acc_mc

    # ---- multiclass ragged N=13 (row padding / sentinel labels) ----
    logits13 = jax.random.normal(ks[2], (13, C), dtype=jnp.float32)
    labels13 = jax.random.randint(ks[3], (13,), 0, C, dtype=jnp.int32)
    acc_mc13 = accuracy(logits13, labels13)
    jax.block_until_ready(acc_mc13)
    assert jnp.allclose(acc_mc13, _accuracy_ref(logits13, labels13), atol=1e-6), acc_mc13

    # ---- multiclass: forced 2-way parallel split + multi-step accumulation ----
    logits100 = jax.random.normal(ks[4], (100, C), dtype=jnp.float32)
    labels100 = jax.random.randint(ks[5], (100,), 0, C, dtype=jnp.int32)
    acc_mc100 = accuracy(logits100, labels100, _force_splits=2, _block_rows=32)
    jax.block_until_ready(acc_mc100)
    assert jnp.allclose(acc_mc100, _accuracy_ref(logits100, labels100), atol=1e-6), acc_mc100

    # ---- binary: logits (16, 1), 0/1 float targets ----
    blogits = jax.random.normal(ks[6], (N, 1), dtype=jnp.float32)
    btarget = jax.random.bernoulli(ks[7], 0.5, (N, 1)).astype(jnp.float32)
    acc_bin = accuracy(blogits, btarget, threshold=0.5)
    jax.block_until_ready(acc_bin)
    assert jnp.allclose(acc_bin, _accuracy_ref(blogits, btarget, 0.5), atol=1e-6), acc_bin

    # ---- binary: bf16 logits, forced split + multi-step + element padding ----
    blog2 = jax.random.normal(ks[8], (20000,), dtype=jnp.float32).astype(jnp.bfloat16)
    btgt2 = jax.random.bernoulli(ks[9], 0.5, (20000,)).astype(jnp.float32)
    acc_bin2 = accuracy(blog2, btgt2, threshold=0.3, _force_splits=2, _block_rows=32)
    jax.block_until_ready(acc_bin2)
    assert jnp.allclose(acc_bin2, _accuracy_ref(blog2, btgt2, 0.3), atol=1e-6), acc_bin2

    print("KERNEL_OK")
</pallas_src>

<mosaic_0001>
module attributes {stable_mosaic.version = 11 : i64} {
  func.func @_acc_multiclass_kernel(%arg0: i32, %arg1: i32, %arg2: memref<32x32xf32, #tpu.memory_space<vmem>>, %arg3: memref<32x1xi32, #tpu.memory_space<vmem>>, %arg4: memref<1x1xf32, #tpu.memory_space<vmem>>, %arg5: memref<32x1xi32, #tpu.memory_space<vmem>>) attributes {dimension_semantics = [#tpu.dimension_semantics<parallel>, #tpu.dimension_semantics<arbitrary>], iteration_bounds = array<i64: 1, 1>, scalar_prefetch = 0 : i64, scratch_operands = 1 : i64, tpu.core_type = #tpu.core_type<tc>, window_params = [{transform_indices = @transform_0, window_bounds = array<i64: 32, 32>}, {transform_indices = @transform_1, window_bounds = array<i64: 32, 1>}, {transform_indices = @transform_2, window_bounds = array<i64: 1, 1>}]} {
    %c0_i32 = arith.constant 0 : i32
    %0 = arith.cmpi eq, %arg1, %c0_i32 : i32
    %1 = arith.extui %0 : i1 to i32
    %c0_i32_0 = arith.constant 0 : i32
    %2 = arith.cmpi ne, %1, %c0_i32_0 : i32
    scf.if %2 {
      %c0_i32_11 = arith.constant 0 : i32
      %22 = vector.broadcast %c0_i32_11 : i32 to vector<32x1xi32>
      %c0_12 = arith.constant 0 : index
      %c0_13 = arith.constant 0 : index
      %23 = vector.load %arg5[%c0_12, %c0_13] : memref<32x1xi32, #tpu.memory_space<vmem>>, vector<32x1xi32>
      tpu.vector_store %arg5[%c0_12, %c0_13], %22 {strides = array<i32>} : memref<32x1xi32, #tpu.memory_space<vmem>>, vector<32x1xi32>,
    } else {
    }
    %c0 = arith.constant 0 : index
    %c0_1 = arith.constant 0 : index
    %3 = vector.load %arg2[%c0, %c0_1] : memref<32x32xf32, #tpu.memory_space<vmem>>, vector<32x32xf32>
    %cst = arith.constant dense<0xFF800000> : vector<32xf32>
    %4 = vector.multi_reduction <maximumf>, %3, %cst [1] : vector<32x32xf32> to vector<32xf32>
    %5 = vector.shape_cast %4 : vector<32xf32> to vector<32x1xf32>
    %6 = tpu.iota {dimensions = array<i32: 1>} : vector<32x32xi32>
    %7 = vector.broadcast %5 : vector<32x1xf32> to vector<32x32xf32>
    %8 = arith.cmpf oeq, %3, %7 : vector<32x32xf32>
    %c32_i32 = arith.constant 32 : i32
    %9 = vector.broadcast %c32_i32 : i32 to vector<32x32xi32>
    %10 = arith.select %8, %6, %9 : vector<32x32xi1>, vector<32x32xi32>
    %cst_2 = arith.constant dense<2147483647> : vector<32xi32>
    %11 = vector.multi_reduction <minsi>, %10, %cst_2 [1] : vector<32x32xi32> to vector<32xi32>
    %12 = vector.shape_cast %11 : vector<32xi32> to vector<32x1xi32>
    %c0_3 = arith.constant 0 : index
    %c0_4 = arith.constant 0 : index
    %13 = vector.load %arg5[%c0_3, %c0_4] : memref<32x1xi32, #tpu.memory_space<vmem>>, vector<32x1xi32>
    %c0_5 = arith.constant 0 : index
    %c0_6 = arith.constant 0 : index
    %14 = vector.load %arg3[%c0_5, %c0_6] : memref<32x1xi32, #tpu.memory_space<vmem>>, vector<32x1xi32>
    %15 = arith.cmpi eq, %12, %14 : vector<32x1xi32>
    %16 = arith.extui %15 : vector<32x1xi1> to vector<32x1xi32>
    %17 = arith.addi %13, %16 : vector<32x1xi32>
    %c0_7 = arith.constant 0 : index
    %c0_8 = arith.constant 0 : index
    %18 = vector.load %arg5[%c0_7, %c0_8] : memref<32x1xi32, #tpu.memory_space<vmem>>, vector<32x1xi32>
    tpu.vector_store %arg5[%c0_7, %c0_8], %17 {strides = array<i32>} : memref<32x1xi32, #tpu.memory_space<vmem>>, vector<32x1xi32>,
    %c0_i32_9 = arith.constant 0 : i32
    %19 = arith.cmpi eq, %arg1, %c0_i32_9 : i32
    %20 = arith.extui %19 : i1 to i32
    %c0_i32_10 = arith.constant 0 : i32
    %21 = arith.cmpi ne, %20, %c0_i32_10 : i32
    scf.if %21 {
      %c0_11 = arith.constant 0 : index
      %c0_12 = arith.constant 0 : index
      %22 = vector.load %arg5[%c0_11, %c0_12] : memref<32x1xi32, #tpu.memory_space<vmem>>, vector<32x1xi32>
      %23 = vector.shape_cast %22 : vector<32x1xi32> to vector<1x32x1xi32>
      %cst_13 = arith.constant dense<0> : vector<1xi32>
      %24 = vector.multi_reduction <add>, %23, %cst_13 [1, 2] : vector<1x32x1xi32> to vector<1xi32>
      %25 = vector.shape_cast %24 : vector<1xi32> to vector<1x1x1xi32>
      %26 = vector.extract %25[0, 0, 0] : i32 from vector<1x1x1xi32>
      %27 = vector.broadcast %26 : i32 to vector<1x1xi32>
      %28 = arith.sitofp %27 : vector<1x1xi32> to vector<1x1xf32>
      %cst_14 = arith.constant 6.250000e-02 : f32
      %29 = vector.broadcast %cst_14 : f32 to vector<1x1xf32>
      %30 = arith.mulf %28, %29 : vector<1x1xf32>
      %c0_15 = arith.constant 0 : index
      %c0_16 = arith.constant 0 : index
      %31 = vector.load %arg4[%c0_15, %c0_16] : memref<1x1xf32, #tpu.memory_space<vmem>>, vector<1x1xf32>
      tpu.vector_store %arg4[%c0_15, %c0_16], %30 {strides = array<i32>} : memref<1x1xf32, #tpu.memory_space<vmem>>, vector<1x1xf32>,
    } else {
    }
    return
  }
  func.func @transform_0(%arg0: i32, %arg1: i32) -> (i32, i32) {
    %c1_i32 = arith.constant 1 : i32
    %0 = arith.muli %arg0, %c1_i32 : i32
    %1 = arith.addi %0, %arg1 : i32
    %c0_i32 = arith.constant 0 : i32
    %c0_i32_0 = arith.constant 0 : i32
    return %1, %c0_i32 : i32, i32
  }
  func.func @transform_1(%arg0: i32, %arg1: i32) -> (i32, i32) {
    %c1_i32 = arith.constant 1 : i32
    %0 = arith.muli %arg0, %c1_i32 : i32
    %1 = arith.addi %0, %arg1 : i32
    %c0_i32 = arith.constant 0 : i32
    %c0_i32_0 = arith.constant 0 : i32
    return %1, %c0_i32 : i32, i32
  }
  func.func @transform_2(%arg0: i32, %arg1: i32) -> (i32, i32) {
    %c0_i32 = arith.constant 0 : i32
    %c0_i32_0 = arith.constant 0 : i32
    return %arg0, %c0_i32 : i32, i32
  }
}

</mosaic_0001>

<bundles_post_ra>
// kernel: tpu_custom_call.1
= control target key start
LH: loop header
LB: loop body
LE: loop exit
PB: predicated region body
PF: predicated region fallthrough
CT: control target
= control target key end

     0   :  { %vm69_vm0 = vcmask 261120   ;;  %s342_s0 = inlined_call_operand.vmem [shape: f32[32,32], index: 0, kind: input, shape index: {}]   ;;  %s343_s1 = inlined_call_operand.vmem [shape: s32[32,1], index: 1, kind: input, shape index: {}]   ;;  %s344_s2 = inlined_call_operand.hbm [shape: f32[1,1], index: 2, kind: output, shape index: {}]  }
   0x1   :  { %v65_v0 = vld [vmem:[%s342_s0] sm:$0xff]  ;;  %v67_v1 = vld [vmem:[%s342_s0 + $0x10] sm:$0xff]  ;;  %v66_v2 = vld [vmem:[%s342_s0 + $0x8] sm:$0xff] }
   0x2   :  { %v70_v3 = vsel %vm69_vm0, %v65_v0, -inf  ;;  %v76_v4 = vsel %vm69_vm0, %v67_v1, -inf  ;;  %v68_v5 = vld [vmem:[%s342_s0 + $0x18] sm:$0xff] }
   0x3   :  { %7 = vsyncpa [#allocation4], 0  ;;  %71 = vmax.xlane.f32.xlu0 %v70_v3  ;;  %77 = vmax.xlane.f32.xlu1 %v76_v4  ;;  %v73_v6 = vsel %vm69_vm0, %v66_v2, -inf  ;;  %v79_v7 = vsel %vm69_vm0, %v68_v5, -inf  ;;  %v82_v8 = vlaneseq  ;;  %vm60_vm9 = vcmask 7168   ;;  %v156_v53 = vld [vmem:[%s343_s1] sm:$0xff] }
   0x4   :  { %v269_v46 = vmov 0   ;;  %s270_s24 = smov [#allocation3]   ;;  %vm213_vm14 = vcmask 0  }
   0x5   :  { %v83_v9 = vand.u32 127, %v82_v8  ;;  %61 = vst.msk [vmem:[#allocation2] sm:$0xff] %vm60_vm9, %v269_v46  ;;  %62 = vst.msk [vmem:[#allocation2 + $0x8] sm:$0xff] %vm60_vm9, %v269_v46  ;;  %s221_s25 = sshll.u32 %s270_s24, 4  ;;  %s222_s25 = int_to_ptr.vmem [resolvable:$true] %s221_s25 }
   0x6   :  { %63 = vst.msk [vmem:[#allocation2 + $0x10] sm:$0xff] %vm60_vm9, %v269_v46  ;;  %64 = vst.msk [vmem:[#allocation2 + $0x18] sm:$0xff] %vm60_vm9, %v269_v46  ;;  %s245_s26 = scalar_lea.vmem %s222_s25, 16  ;;  %s249_s27 = scalar_lea.vmem %s222_s25, 32 }
   0x7   :  { %74 = vmax.xlane.f32.xlu0 %v73_v6  ;;  %80 = vmax.xlane.f32.xlu1 %v79_v7  ;;  %p246_p0 = scmp.ne.s32.totalorder %s222_s25, %s245_s26  ;;  %p250_p1 = scmp.lt.s32.totalorder %s222_s25, %s222_s25 }
   0x8   :  { %p251_p2 = scmp.lt.s32.totalorder %s249_s27, %s245_s26 }
   0xa   :  { %p252_p3 = por %p251_p2, %p250_p1 }
   0xc   :  { %v152_v57 = vld [vmem:[#allocation2] sm:$0xff]  ;;  %p253_p4 = pnand %p252_p3, %p246_p0 }
   0xd   :  { %v154_v6 = vld [vmem:[#allocation2 + $0x10] sm:$0xff] }
  0x90   :  { %v72_v10 = vpop.xlane.xlu0 %71  ;;  %v78_v11 = vpop.xlane.xlu1 %77 }
  0x91   :  { %vm84_vm1 = vcmp.eq.f32.partialorder %v65_v0, %v72_v10  ;;  %vm86_vm2 = vcmp.eq.f32.partialorder %v67_v1, %v78_v11  ;;  %v157_v0 = vld [vmem:[%s343_s1 + $0x8] sm:$0xff]  ;;  %v158_v1 = vld [vmem:[%s343_s1 + $0x10] sm:$0xff] }
  0x92   :  { %v88_v12 = vsel %vm84_vm1, %v83_v9, 32  ;;  %v90_v13 = vsel %vm86_vm2, %v83_v9, 32 }
  0x93   :  { %v92_v14 = vsel %vm69_vm0, %v88_v12, 2147483647  ;;  %v122_v15 = vsel %vm69_vm0, %v90_v13, 2147483647  ;;  %v159_v12 = vld [vmem:[%s343_s1 + $0x18] sm:$0xff] }
  0x94   :  { %v75_v16 = vpop.xlane.xlu0 %74  ;;  %v81_v17 = vpop.xlane.xlu1 %80  ;;  %v94_v18 = vshra.s32 %v92_v14, 16  ;;  %v124_v19 = vshra.s32 %v122_v15, 16  ;;  %v93_v30 = vand.u32 65535, %v92_v14  ;;  %v123_v34 = vand.u32 65535, %v122_v15 }
  0x95   :  { %vm85_vm3 = vcmp.eq.f32.partialorder %v66_v2, %v75_v16  ;;  %vm87_vm4 = vcmp.eq.f32.partialorder %v68_v5, %v81_v17  ;;  %v153_v5 = vld [vmem:[#allocation2 + $0x8] sm:$0xff]  ;;  %v155_v16 = vld [vmem:[#allocation2 + $0x18] sm:$0xff] }
  0x96   :  { %v89_v20 = vsel %vm85_vm3, %v83_v9, 32  ;;  %v91_v21 = vsel %vm87_vm4, %v83_v9, 32  ;;  %v96_v22 = vcvt.s32.f32 %v94_v18  ;;  %v126_v25 = vcvt.s32.f32 %v124_v19 }
  0x97   :  { %v107_v23 = vsel %vm69_vm0, %v89_v20, 2147483647  ;;  %v137_v24 = vsel %vm69_vm0, %v91_v21, 2147483647  ;;  %v95_v32 = vcvt.s32.f32 %v93_v30  ;;  %v125_v39 = vcvt.s32.f32 %v123_v34 }
  0x98   :  { %97 = vmin.xlane.f32.xlu0 %v96_v22  ;;  %v109_v26 = vshra.s32 %v107_v23, 16  ;;  %v139_v27 = vshra.s32 %v137_v24, 16  ;;  %v108_v33 = vand.u32 65535, %v107_v23  ;;  %v138_v40 = vand.u32 65535, %v137_v24 }
  0x9a   :  { %v111_v28 = vcvt.s32.f32 %v109_v26  ;;  %v141_v29 = vcvt.s32.f32 %v139_v27  ;;  %v110_v38 = vcvt.s32.f32 %v108_v33  ;;  %v140_v44 = vcvt.s32.f32 %v138_v40 }
  0x9c   :  { %127 = vmin.xlane.f32.xlu0 %v126_v25  ;;  %112 = vmin.xlane.f32.xlu1 %v111_v28 }
  0xa0   :  { %142 = vmin.xlane.f32.xlu1 %v141_v29 }
 0x125   :  { %v98_v31 = vpop.xlane.xlu0 %97 }
 0x126   :  { %vm99_vm5 = vcmp.eq.f32.partialorder %v96_v22, %v98_v31  ;;  %v104_v47 = vcvt.f32.s32 %v98_v31 }
 0x127   :  { %v100_v35 = vsel %vm99_vm5, %v95_v32, inf }
 0x128   :  { %101 = vmin.xlane.f32.xlu0 %v100_v35  ;;  %v105_v51 = vshll.u32 %v104_v47, 16 }
 0x129   :  { %v113_v36 = vpop.xlane.xlu1 %112  ;;  %v128_v37 = vpop.xlane.xlu0 %127 }
 0x12a   :  { %vm114_vm6 = vcmp.eq.f32.partialorder %v111_v28, %v113_v36  ;;  %vm129_vm7 = vcmp.eq.f32.partialorder %v126_v25, %v128_v37  ;;  %v119_v48 = vcvt.f32.s32 %v113_v36  ;;  %v134_v49 = vcvt.f32.s32 %v128_v37 }
 0x12b   :  { %v115_v41 = vsel %vm114_vm6, %v110_v38, inf  ;;  %v130_v42 = vsel %vm129_vm7, %v125_v39, inf }
 0x12c   :  { %116 = vmin.xlane.f32.xlu1 %v115_v41  ;;  %131 = vmin.xlane.f32.xlu0 %v130_v42  ;;  %v120_v55 = vshll.u32 %v119_v48, 16  ;;  %v135_v56 = vshll.u32 %v134_v49, 16 }
 0x12d   :  { %v143_v43 = vpop.xlane.xlu1 %142 }
 0x12e   :  { %vm144_vm8 = vcmp.eq.f32.partialorder %v141_v29, %v143_v43  ;;  %v149_v60 = vcvt.f32.s32 %v143_v43 }
 0x12f   :  { %v145_v45 = vsel %vm144_vm8, %v140_v44, inf }
 0x130   :  { %146 = vmin.xlane.f32.xlu1 %v145_v45  ;;  %v150_v8 = vshll.u32 %v149_v60, 16 }
 0x1b5   :  { %v102_v50 = vpop.xlane.xlu0 %101 }
 0x1b6   :  { %v103_v52 = vcvt.f32.s32 %v102_v50 }
 0x1b8   :  { %v106_v54 = vadd.s32 %v105_v51, %v103_v52 }
 0x1b9   :  { %v117_v58 = vpop.xlane.xlu1 %116  ;;  %v132_v59 = vpop.xlane.xlu0 %131 }
 0x1ba   :  { %vm160_vm10 = vcmp.eq.s32.totalorder %v106_v54, %v156_v53  ;;  %v118_v61 = vcvt.f32.s32 %v117_v58  ;;  %v133_v62 = vcvt.f32.s32 %v132_v59 }
 0x1bb   :  { %v164_v63 = vsel %vm160_vm10, 1, %v269_v46 }
 0x1bc   :  { %v168_v2 = vadd.s32 %v164_v63, %v152_v57  ;;  %v121_v3 = vadd.s32 %v120_v55, %v118_v61  ;;  %v136_v4 = vadd.s32 %v135_v56, %v133_v62 }
 0x1bd   :  { %v147_v7 = vpop.xlane.xlu1 %146 }
 0x1be   :  { %173 = vst.msk [vmem:[#allocation2] sm:$0xff] %vm60_vm9, %v168_v2  ;;  %vm161_vm11 = vcmp.eq.s32.totalorder %v121_v3, %v157_v0  ;;  %vm162_vm12 = vcmp.eq.s32.totalorder %v136_v4, %v158_v1  ;;  %v148_v9 = vcvt.f32.s32 %v147_v7 }
 0x1bf   :  { %v165_v10 = vsel %vm161_vm11, 1, %v269_v46  ;;  %v166_v11 = vsel %vm162_vm12, 1, %v269_v46 }
 0x1c0   :  { %v169_v13 = vadd.s32 %v165_v10, %v153_v5  ;;  %v170_v14 = vadd.s32 %v166_v11, %v154_v6  ;;  %v151_v15 = vadd.s32 %v150_v8, %v148_v9 }
 0x1c2   :  { %174 = vst.msk [vmem:[#allocation2 + $0x8] sm:$0xff] %vm60_vm9, %v169_v13  ;;  %175 = vst.msk [vmem:[#allocation2 + $0x10] sm:$0xff] %vm60_vm9, %v170_v14  ;;  %vm163_vm13 = vcmp.eq.s32.totalorder %v151_v15, %v159_v12 }
 0x1c3   :  { %v167_v17 = vsel %vm163_vm13, 1, %v269_v46 }
 0x1c4   :  { %v171_v18 = vadd.s32 %v167_v17, %v155_v16 }
 0x1c5   :  { %v180_v20 = vld [vmem:[#allocation2] sm:$0xff] }
 0x1c6   :  { %176 = vst.msk [vmem:[#allocation2 + $0x18] sm:$0xff] %vm60_vm9, %v171_v18  ;;  %v184_v24 = vsel %vm60_vm9, %v180_v20, 0 }
 0x1c9   :  { %v181_v19 = vld [vmem:[#allocation2 + $0x8] sm:$0xff]  ;;  %v182_v21 = vld [vmem:[#allocation2 + $0x10] sm:$0xff] }
 0x1ca   :  { %v185_v22 = vsel %vm60_vm9, %v181_v19, 0  ;;  %v186_v25 = vsel %vm60_vm9, %v182_v21, 0 }
 0x1cb   :  { %v188_v27 = vadd.s32 %v185_v22, %v184_v24 }
 0x1cd   :  { %v183_v23 = vld [vmem:[#allocation2 + $0x18] sm:$0xff] }
 0x1ce   :  { %v187_v26 = vsel %vm60_vm9, %v183_v23, 0 }
 0x1cf   :  { %v189_v28 = vadd.s32 %v187_v26, %v186_v25 }
 0x1d1   :  { %v190_v29 = vadd.s32 %v189_v28, %v188_v27 }
 0x1d3   :  { %v192_v30 = vshrl.u32 %v190_v29, 16  ;;  %v191_v31 = vand.u32 65535, %v190_v29 }
 0x1d5   :  { %v194_v32 = vcvt.s32.f32 %v192_v30  ;;  %v193_v33 = vcvt.s32.f32 %v191_v31 }
 0x1d7   :  { %197 = vadd.xlane.f32.xlu0 %v194_v32  ;;  %195 = vadd.xlane.f32.xlu1 %v193_v33 }
 0x264   :  { %v198_v34 = vpop.xlane.xlu0 %197  ;;  %v196_v35 = vpop.xlane.xlu1 %195 }
 0x265   :  { %v200_v36 = vcvt.f32.s32 %v198_v34  ;;  %v199_v38 = vcvt.f32.s32 %v196_v35 }
 0x267   :  { %v201_v37 = vshll.u32 %v200_v36, 16 }
 0x269   :  { %v202_v39 = vadd.s32 %v201_v37, %v199_v38 }
 0x26b   :  { %v203_v40 = vrot.slane %v202_v39, 4 }
 0x26d   :  { %v204_v41 = vadd.s32 %v203_v40, %v202_v39 }
 0x26f   :  { %v205_v42 = vrot.slane %v204_v41, 2 }
 0x271   :  { %v206_v43 = vadd.s32 %v205_v42, %v204_v41 }
 0x273   :  { %v207_v44 = vrot.slane %v206_v43, 1 }
 0x275   :  { %v208_v45 = vadd.s32 %v207_v44, %v206_v43 }
 0x277   :  { %241 = vpush %v208_v45 }
 0x2a8   :  { %s242_s1 = spop %241 }
 0x2a9   :  { %v210_v46 = vstv %s242_s1 }
 0x2aa   :  { %v211_v47 = vcvt.s32.f32 %v210_v46 }
 0x2ac   :  { %v212_v48 = vmul.f32 0.0625, %v211_v47 }
 0x2ae   :  { %214 = vst.msk [vmem:[#allocation3] sm:$0x1] %vm213_vm14, %v212_v48 }
 0x2af   :  { %256 = shalt.err (!%p253_p4)
}
 0x2b0   :  { %s257_s30 = scalar_lea.hbm %s344_s2, 16 }
 0x2b1   :  { %p258_p5 = scmp.ne.s32.totalorder %s344_s2, %s257_s30  ;;  %p261_p6 = scmp.lt.u32.totalorder %s257_s30, %s344_s2 }
 0x2b3   :  { %p263_p7 = pnand %p261_p6, %p258_p5 }
 0x2b5   :  { %266 = shalt.err (!%p263_p7)
}
 0x2b6   :  { %224 = dma.vmem_to_hbm [thread:$0]  %s222_s25, 16, %s344_s2, [#allocation4]  }
 0x2b7   :  { %267 = dma.done.wait [#allocation4], 16  }
 0x2b8   :  { %268 = vsyncadd [#allocation4], 4294967280 }
 0x2b9   :  { %228 = vsyncpa [#allocation4], 1 }

</bundles_post_ra>
